<compile_context>
chip_gen: v7x
topology: tpu7x:2x2x1
jax: 0.10.0
libtpu: 0.0.40
codegen_flags: <defaults>
</compile_context>

<pallas_src>
import math

import jax
import jax.numpy as jnp
from jax import lax
from jax.experimental import pallas as pl
from jax.experimental.pallas import tpu as pltpu

EMBED_SIZE = 32
HIDDEN_SIZE = 64
VOCAB_PAD = 128          # lane-dense padding for the target-vocab axis
NEG_INF = -1e30

translation_pairs = [
    ("i am a student", "je suis un étudiant"),
    ("he is a teacher", "il est un professeur"),
    ("she is happy", "elle est heureuse"),
    ("they are playing", "ils jouent"),
    ("you are smart", "tu es intelligent"),
]


def tokenize(sentence):
    return sentence.lower().split()


def build_vocabulary(sentences):
    vocab = {"<pad>": 0, "<sos>": 1, "<eos>": 2}
    index = 3
    for sentence in sentences:
        for word in tokenize(sentence):
            if word not in vocab:
                vocab[word] = index
                index += 1
    return vocab


source_vocab = build_vocabulary([src for src, _ in translation_pairs])
target_vocab = build_vocabulary([tgt for _, tgt in translation_pairs])
SRC_VOCAB_SIZE = len(source_vocab)
TGT_VOCAB_SIZE = len(target_vocab)
SRC_PAD = ((SRC_VOCAB_SIZE + 7) // 8) * 8


# ----------------------------- Pallas kernel ------------------------------ #
def seq2seq_kernel(
    tf_ref, src_ref, tgt_ref,        # SMEM int32: (tgt_len,), (src_len,), (tgt_len,)
    enc_comb_ref,                    # VMEM [SRC_PAD, H]   : enc_emb @ W_ih + b (row-folded)
    enc_whh_ref,                     # VMEM [H, H]
    dec_comb_ref,                    # VMEM [VOCAB_PAD, H] : dec_emb @ W_ih + b (row-folded)
    w_cat_ref,                       # VMEM [H, VOCAB_PAD + H] = [fc_w_pad | dec_whh]
    fc_b_ref,                        # VMEM [1, VOCAB_PAD] (padded lanes = -1e30)
    out_ref,                         # VMEM [out_rows, VOCAB_PAD]
):
    src_len = src_ref.shape[0]
    tgt_len = tgt_ref.shape[0]
    hidden = enc_whh_ref.shape[0]
    vpad = fc_b_ref.shape[1]
    out_rows = out_ref.shape[0]

    lane_iota = lax.broadcasted_iota(jnp.int32, (1, vpad), 1).astype(jnp.float32)

    # ---- Encoder scan (fully unrolled): h = tanh(enc_comb[src[t]] + h @ W_hh) ----
    enc_whh = enc_whh_ref[...]                       # scoped read: dies before decoder
    h = jnp.zeros((1, hidden), jnp.float32)
    for t in range(src_len):
        x = enc_comb_ref[pl.ds(src_ref[t], 1), :]    # scalar-indexed row gather (bias folded)
        h = jnp.tanh(x + jnp.dot(h, enc_whh, preferred_element_type=jnp.float32))

    # ---- Decoder (fully unrolled); fused per-step matmul h @ [fc_w | W_hh] ----
    w_cat = w_cat_ref[...]
    fc_b = fc_b_ref[...]

    # Seed the recurrence contribution hw = h_enc @ W_hh_dec via the fused weight.
    y = jnp.dot(h, w_cat, preferred_element_type=jnp.float32)
    hw = y[:, vpad:vpad + hidden]
    x_in = dec_comb_ref[pl.ds(tgt_ref[0], 1), :]     # first decoder input = tgt[0] (<sos>)

    rows = [jnp.zeros((1, vpad), jnp.float32)]       # outputs[0] stays all-zeros (torch.zeros)
    for t in range(1, tgt_len):
        h = jnp.tanh(x_in + hw)                      # biases already folded into x_in rows
        y = jnp.dot(h, w_cat, preferred_element_type=jnp.float32)   # one MXU push per step
        logits = y[:, :vpad] + fc_b                  # padded lanes ~ -1e30
        rows.append(logits)

        if t < tgt_len - 1:                          # last step's next-input is dead in torch too
            hw = y[:, vpad:vpad + hidden]
            # greedy top1 = first maximum index (matches torch.argmax); padded lanes can't win
            maxv = jnp.max(logits, axis=1, keepdims=True)
            cand = jnp.where(logits == maxv, lane_iota, float(vpad))
            am_idx = jnp.min(cand).astype(jnp.int32)
            # teacher forcing: scalar token select on SMEM mask, then a single row gather
            tok = jnp.where(tf_ref[t] == 1, tgt_ref[t], am_idx)
            x_in = dec_comb_ref[pl.ds(tok, 1), :]

    for _ in range(out_rows - tgt_len):
        rows.append(jnp.zeros((1, vpad), jnp.float32))
    # single lane+sublane-dense store (no per-step masked row writes)
    out_ref[...] = jnp.concatenate(rows, axis=0)


# ------------------------------ JAX wrapper -------------------------------- #
def seq2seq_forward(src, tgt, tf_mask, params):
    (enc_emb, enc_wih, enc_whh, enc_b,
     dec_emb, dec_wih, dec_whh, dec_b,
     fc_w, fc_b) = params
    tgt_len = tgt.shape[0]
    out_rows = ((tgt_len + 7) // 8) * 8

    # Algebraic folds done once outside the serial kernel (one-hot rows sum to exactly 1,
    # so per-token input contribution = one row of E @ W_ih + b).
    enc_comb = enc_emb @ enc_wih + enc_b                             # [src_v, H]
    enc_comb_p = jnp.zeros((SRC_PAD, HIDDEN_SIZE), jnp.float32).at[:SRC_VOCAB_SIZE].set(enc_comb)

    dec_comb = dec_emb @ dec_wih + dec_b                             # [tgt_v, H]
    dec_comb_p = jnp.zeros((VOCAB_PAD, HIDDEN_SIZE), jnp.float32).at[:TGT_VOCAB_SIZE].set(dec_comb)

    fc_w_p = jnp.zeros((HIDDEN_SIZE, VOCAB_PAD), jnp.float32).at[:, :TGT_VOCAB_SIZE].set(fc_w)
    # padded logit lanes forced to -inf-ish so argmax never picks a padded index
    fc_b_p = jnp.full((1, VOCAB_PAD), NEG_INF, jnp.float32).at[:, :TGT_VOCAB_SIZE].set(fc_b)

    # Fused decoder RHS: one matmul per step produces [logits | h @ W_hh_dec].
    w_cat = jnp.concatenate([fc_w_p, dec_whh], axis=1)               # [H, VOCAB_PAD + H]

    smem = pl.BlockSpec(memory_space=pltpu.MemorySpace.SMEM)
    vmem = pl.BlockSpec(memory_space=pltpu.MemorySpace.VMEM)
    out_pad = pl.pallas_call(
        seq2seq_kernel,
        out_shape=jax.ShapeDtypeStruct((out_rows, VOCAB_PAD), jnp.float32),
        in_specs=[smem, smem, smem, vmem, vmem, vmem, vmem, vmem],
        out_specs=vmem,
    )(
        tf_mask.astype(jnp.int32),
        src.astype(jnp.int32),
        tgt.astype(jnp.int32),
        enc_comb_p, enc_whh,
        dec_comb_p, w_cat, fc_b_p,
    )
    return out_pad[:tgt_len, :TGT_VOCAB_SIZE]


seq2seq_forward = jax.jit(seq2seq_forward)


def init_params(key):
    """Deterministic synthetic parameters (torch-style uniform/normal shapes)."""
    ks = jax.random.split(key, 10)
    k_rnn = 1.0 / math.sqrt(HIDDEN_SIZE)
    k_fc = 1.0 / math.sqrt(HIDDEN_SIZE)
    u = lambda k, shape, b: jax.random.uniform(k, shape, jnp.float32, -b, b)

    enc_emb = jax.random.normal(ks[0], (SRC_VOCAB_SIZE, EMBED_SIZE), jnp.float32)
    enc_wih = u(ks[1], (EMBED_SIZE, HIDDEN_SIZE), k_rnn)       # W_ih^T
    enc_whh = u(ks[2], (HIDDEN_SIZE, HIDDEN_SIZE), k_rnn)      # W_hh^T
    enc_b = u(ks[3], (1, HIDDEN_SIZE), k_rnn)                  # b_ih + b_hh (combined)

    dec_emb = jax.random.normal(ks[4], (TGT_VOCAB_SIZE, EMBED_SIZE), jnp.float32)
    dec_wih = u(ks[5], (EMBED_SIZE, HIDDEN_SIZE), k_rnn)
    dec_whh = u(ks[6], (HIDDEN_SIZE, HIDDEN_SIZE), k_rnn)
    dec_b = u(ks[7], (1, HIDDEN_SIZE), k_rnn)

    fc_w = u(ks[8], (HIDDEN_SIZE, TGT_VOCAB_SIZE), k_fc)       # fc.weight^T
    fc_b = u(ks[9], (1, TGT_VOCAB_SIZE), k_fc)

    return (enc_emb, enc_wih, enc_whh, enc_b,
            dec_emb, dec_wih, dec_whh, dec_b,
            fc_w, fc_b)


if __name__ == "__main__":
    key = jax.random.PRNGKey(0)
    k_params, k_tf = jax.random.split(key)

    params = init_params(k_params)

    # Example pair: "i am a student" -> "<sos> je suis un étudiant <eos>"
    src_sentence, tgt_sentence = translation_pairs[0]
    src_ids = [source_vocab[w] for w in tokenize(src_sentence)] + [source_vocab["<eos>"]]
    tgt_ids = ([target_vocab["<sos>"]]
               + [target_vocab[w] for w in tokenize(tgt_sentence)]
               + [target_vocab["<eos>"]])

    src = jnp.asarray(src_ids, dtype=jnp.int32)                 # [src_len]
    tgt = jnp.asarray(tgt_ids, dtype=jnp.int32)                 # [tgt_len]

    # Deterministic replacement for `random.random() < teacher_forcing_ratio` per step.
    teacher_forcing_ratio = 0.5
    tf_mask = (jax.random.uniform(k_tf, (tgt.shape[0],)) < teacher_forcing_ratio
               ).astype(jnp.int32)

    outputs = seq2seq_forward(src, tgt, tf_mask, params)
    outputs = jax.block_until_ready(outputs)

    assert outputs.shape == (tgt.shape[0], TGT_VOCAB_SIZE)
    assert bool(jnp.all(outputs[0] == 0.0))
    assert bool(jnp.all(jnp.isfinite(outputs)))
    # TODO(synk): batch multiple sentence pairs along sublanes / a parallel grid axis for
    # v7x's second TensorCore; kept batch=1 to match the module's per-pair forward.
    print("KERNEL_OK")
</pallas_src>

<mosaic_0001>
module attributes {stable_mosaic.version = 11 : i64} {
  func.func @seq2seq_kernel(%arg0: memref<6xi32, #tpu.memory_space<smem>>, %arg1: memref<5xi32, #tpu.memory_space<smem>>, %arg2: memref<6xi32, #tpu.memory_space<smem>>, %arg3: memref<24x64xf32, #tpu.memory_space<vmem>>, %arg4: memref<64x64xf32, #tpu.memory_space<vmem>>, %arg5: memref<128x64xf32, #tpu.memory_space<vmem>>, %arg6: memref<64x192xf32, #tpu.memory_space<vmem>>, %arg7: memref<1x128xf32, #tpu.memory_space<vmem>>, %arg8: memref<8x128xf32, #tpu.memory_space<vmem>>) attributes {dimension_semantics = [], scalar_prefetch = 0 : i64, scratch_operands = 0 : i64, tpu.core_type = #tpu.core_type<tc>} {
    %0 = tpu.iota {dimensions = array<i32: 1>} : vector<1x128xi32>
    %1 = arith.sitofp %0 : vector<1x128xi32> to vector<1x128xf32>
    %c0 = arith.constant 0 : index
    %c0_0 = arith.constant 0 : index
    %2 = vector.load %arg4[%c0, %c0_0] : memref<64x64xf32, #tpu.memory_space<vmem>>, vector<64x64xf32>
    %cst = arith.constant 0.000000e+00 : f32
    %3 = vector.broadcast %cst : f32 to vector<1x64xf32>
    %c0_1 = arith.constant 0 : index
    %4 = memref.load %arg1[%c0_1] : memref<5xi32, #tpu.memory_space<smem>>
    %5 = arith.index_cast %4 : i32 to index
    %c0_2 = arith.constant 0 : index
    %6 = vector.load %arg3[%5, %c0_2] : memref<24x64xf32, #tpu.memory_space<vmem>>, vector<1x64xf32>
    %cst_3 = arith.constant dense<0.000000e+00> : vector<1x64xf32>
    %7 = tpu.matmul %3, %2, %cst_3 {dimension_numbers = #tpu.dot_dimension_numbers<[1], [0], [0], [1], [0, 0, 1, 1], [], []>} : vector<1x64xf32>, vector<64x64xf32>, vector<1x64xf32> -> vector<1x64xf32>
    %8 = arith.addf %6, %7 : vector<1x64xf32>
    %9 = math.tanh %8 : vector<1x64xf32>
    %c1 = arith.constant 1 : index
    %10 = memref.load %arg1[%c1] : memref<5xi32, #tpu.memory_space<smem>>
    %11 = arith.index_cast %10 : i32 to index
    %c0_4 = arith.constant 0 : index
    %12 = vector.load %arg3[%11, %c0_4] : memref<24x64xf32, #tpu.memory_space<vmem>>, vector<1x64xf32>
    %cst_5 = arith.constant dense<0.000000e+00> : vector<1x64xf32>
    %13 = tpu.matmul %9, %2, %cst_5 {dimension_numbers = #tpu.dot_dimension_numbers<[1], [0], [0], [1], [0, 0, 1, 1], [], []>} : vector<1x64xf32>, vector<64x64xf32>, vector<1x64xf32> -> vector<1x64xf32>
    %14 = arith.addf %12, %13 : vector<1x64xf32>
    %15 = math.tanh %14 : vector<1x64xf32>
    %c2 = arith.constant 2 : index
    %16 = memref.load %arg1[%c2] : memref<5xi32, #tpu.memory_space<smem>>
    %17 = arith.index_cast %16 : i32 to index
    %c0_6 = arith.constant 0 : index
    %18 = vector.load %arg3[%17, %c0_6] : memref<24x64xf32, #tpu.memory_space<vmem>>, vector<1x64xf32>
    %cst_7 = arith.constant dense<0.000000e+00> : vector<1x64xf32>
    %19 = tpu.matmul %15, %2, %cst_7 {dimension_numbers = #tpu.dot_dimension_numbers<[1], [0], [0], [1], [0, 0, 1, 1], [], []>} : vector<1x64xf32>, vector<64x64xf32>, vector<1x64xf32> -> vector<1x64xf32>
    %20 = arith.addf %18, %19 : vector<1x64xf32>
    %21 = math.tanh %20 : vector<1x64xf32>
    %c3 = arith.constant 3 : index
    %22 = memref.load %arg1[%c3] : memref<5xi32, #tpu.memory_space<smem>>
    %23 = arith.index_cast %22 : i32 to index
    %c0_8 = arith.constant 0 : index
    %24 = vector.load %arg3[%23, %c0_8] : memref<24x64xf32, #tpu.memory_space<vmem>>, vector<1x64xf32>
    %cst_9 = arith.constant dense<0.000000e+00> : vector<1x64xf32>
    %25 = tpu.matmul %21, %2, %cst_9 {dimension_numbers = #tpu.dot_dimension_numbers<[1], [0], [0], [1], [0, 0, 1, 1], [], []>} : vector<1x64xf32>, vector<64x64xf32>, vector<1x64xf32> -> vector<1x64xf32>
    %26 = arith.addf %24, %25 : vector<1x64xf32>
    %27 = math.tanh %26 : vector<1x64xf32>
    %c4 = arith.constant 4 : index
    %28 = memref.load %arg1[%c4] : memref<5xi32, #tpu.memory_space<smem>>
    %29 = arith.index_cast %28 : i32 to index
    %c0_10 = arith.constant 0 : index
    %30 = vector.load %arg3[%29, %c0_10] : memref<24x64xf32, #tpu.memory_space<vmem>>, vector<1x64xf32>
    %cst_11 = arith.constant dense<0.000000e+00> : vector<1x64xf32>
    %31 = tpu.matmul %27, %2, %cst_11 {dimension_numbers = #tpu.dot_dimension_numbers<[1], [0], [0], [1], [0, 0, 1, 1], [], []>} : vector<1x64xf32>, vector<64x64xf32>, vector<1x64xf32> -> vector<1x64xf32>
    %32 = arith.addf %30, %31 : vector<1x64xf32>
    %33 = math.tanh %32 : vector<1x64xf32>
    %c0_12 = arith.constant 0 : index
    %c0_13 = arith.constant 0 : index
    %34 = vector.load %arg6[%c0_12, %c0_13] : memref<64x192xf32, #tpu.memory_space<vmem>>, vector<64x192xf32>
    %c0_14 = arith.constant 0 : index
    %c0_15 = arith.constant 0 : index
    %35 = vector.load %arg7[%c0_14, %c0_15] : memref<1x128xf32, #tpu.memory_space<vmem>>, vector<1x128xf32>
    %cst_16 = arith.constant dense<0.000000e+00> : vector<1x192xf32>
    %36 = tpu.matmul %33, %34, %cst_16 {dimension_numbers = #tpu.dot_dimension_numbers<[1], [0], [0], [1], [0, 0, 1, 1], [], []>} : vector<1x64xf32>, vector<64x192xf32>, vector<1x192xf32> -> vector<1x192xf32>
    %37 = vector.extract_strided_slice %36 {offsets = [0, 128], sizes = [1, 64], strides = [1, 1]} : vector<1x192xf32> to vector<1x64xf32>
    %c0_17 = arith.constant 0 : index
    %38 = memref.load %arg2[%c0_17] : memref<6xi32, #tpu.memory_space<smem>>
    %39 = arith.index_cast %38 : i32 to index
    %c0_18 = arith.constant 0 : index
    %40 = vector.load %arg5[%39, %c0_18] : memref<128x64xf32, #tpu.memory_space<vmem>>, vector<1x64xf32>
    %cst_19 = arith.constant 0.000000e+00 : f32
    %41 = vector.broadcast %cst_19 : f32 to vector<1x128xf32>
    %42 = arith.addf %40, %37 : vector<1x64xf32>
    %43 = math.tanh %42 : vector<1x64xf32>
    %cst_20 = arith.constant dense<0.000000e+00> : vector<1x192xf32>
    %44 = tpu.matmul %43, %34, %cst_20 {dimension_numbers = #tpu.dot_dimension_numbers<[1], [0], [0], [1], [0, 0, 1, 1], [], []>} : vector<1x64xf32>, vector<64x192xf32>, vector<1x192xf32> -> vector<1x192xf32>
    %45 = vector.extract_strided_slice %44 {offsets = [0, 0], sizes = [1, 128], strides = [1, 1]} : vector<1x192xf32> to vector<1x128xf32>
    %46 = arith.addf %45, %35 : vector<1x128xf32>
    %47 = vector.extract_strided_slice %44 {offsets = [0, 128], sizes = [1, 64], strides = [1, 1]} : vector<1x192xf32> to vector<1x64xf32>
    %cst_21 = arith.constant dense<0xFF800000> : vector<1xf32>
    %48 = vector.multi_reduction <maximumf>, %46, %cst_21 [1] : vector<1x128xf32> to vector<1xf32>
    %49 = vector.shape_cast %48 : vector<1xf32> to vector<1x1xf32>
    %50 = vector.broadcast %49 : vector<1x1xf32> to vector<1x128xf32>
    %51 = arith.cmpf oeq, %46, %50 : vector<1x128xf32>
    %cst_22 = arith.constant 1.280000e+02 : f32
    %52 = vector.broadcast %cst_22 : f32 to vector<1x128xf32>
    %53 = arith.select %51, %1, %52 : vector<1x128xi1>, vector<1x128xf32>
    %54 = vector.shape_cast %53 : vector<1x128xf32> to vector<1x1x128xf32>
    %cst_23 = arith.constant dense<0x7F800000> : vector<1xf32>
    %55 = vector.multi_reduction <minimumf>, %54, %cst_23 [1, 2] : vector<1x1x128xf32> to vector<1xf32>
    %56 = vector.shape_cast %55 : vector<1xf32> to vector<1x1x1xf32>
    %57 = vector.extract %56[0, 0, 0] : f32 from vector<1x1x1xf32>
    %58 = arith.fptosi %57 : f32 to i32
    %c1_24 = arith.constant 1 : index
    %59 = memref.load %arg0[%c1_24] : memref<6xi32, #tpu.memory_space<smem>>
    %c1_i32 = arith.constant 1 : i32
    %60 = arith.cmpi eq, %59, %c1_i32 : i32
    %c1_25 = arith.constant 1 : index
    %61 = memref.load %arg2[%c1_25] : memref<6xi32, #tpu.memory_space<smem>>
    %62 = arith.select %60, %61, %58 : i32
    %63 = arith.index_cast %62 : i32 to index
    %c0_26 = arith.constant 0 : index
    %64 = vector.load %arg5[%63, %c0_26] : memref<128x64xf32, #tpu.memory_space<vmem>>, vector<1x64xf32>
    %65 = arith.addf %64, %47 : vector<1x64xf32>
    %66 = math.tanh %65 : vector<1x64xf32>
    %cst_27 = arith.constant dense<0.000000e+00> : vector<1x192xf32>
    %67 = tpu.matmul %66, %34, %cst_27 {dimension_numbers = #tpu.dot_dimension_numbers<[1], [0], [0], [1], [0, 0, 1, 1], [], []>} : vector<1x64xf32>, vector<64x192xf32>, vector<1x192xf32> -> vector<1x192xf32>
    %68 = vector.extract_strided_slice %67 {offsets = [0, 0], sizes = [1, 128], strides = [1, 1]} : vector<1x192xf32> to vector<1x128xf32>
    %69 = arith.addf %68, %35 : vector<1x128xf32>
    %70 = vector.extract_strided_slice %67 {offsets = [0, 128], sizes = [1, 64], strides = [1, 1]} : vector<1x192xf32> to vector<1x64xf32>
    %cst_28 = arith.constant dense<0xFF800000> : vector<1xf32>
    %71 = vector.multi_reduction <maximumf>, %69, %cst_28 [1] : vector<1x128xf32> to vector<1xf32>
    %72 = vector.shape_cast %71 : vector<1xf32> to vector<1x1xf32>
    %73 = vector.broadcast %72 : vector<1x1xf32> to vector<1x128xf32>
    %74 = arith.cmpf oeq, %69, %73 : vector<1x128xf32>
    %cst_29 = arith.constant 1.280000e+02 : f32
    %75 = vector.broadcast %cst_29 : f32 to vector<1x128xf32>
    %76 = arith.select %74, %1, %75 : vector<1x128xi1>, vector<1x128xf32>
    %77 = vector.shape_cast %76 : vector<1x128xf32> to vector<1x1x128xf32>
    %cst_30 = arith.constant dense<0x7F800000> : vector<1xf32>
    %78 = vector.multi_reduction <minimumf>, %77, %cst_30 [1, 2] : vector<1x1x128xf32> to vector<1xf32>
    %79 = vector.shape_cast %78 : vector<1xf32> to vector<1x1x1xf32>
    %80 = vector.extract %79[0, 0, 0] : f32 from vector<1x1x1xf32>
    %81 = arith.fptosi %80 : f32 to i32
    %c2_31 = arith.constant 2 : index
    %82 = memref.load %arg0[%c2_31] : memref<6xi32, #tpu.memory_space<smem>>
    %c1_i32_32 = arith.constant 1 : i32
    %83 = arith.cmpi eq, %82, %c1_i32_32 : i32
    %c2_33 = arith.constant 2 : index
    %84 = memref.load %arg2[%c2_33] : memref<6xi32, #tpu.memory_space<smem>>
    %85 = arith.select %83, %84, %81 : i32
    %86 = arith.index_cast %85 : i32 to index
    %c0_34 = arith.constant 0 : index
    %87 = vector.load %arg5[%86, %c0_34] : memref<128x64xf32, #tpu.memory_space<vmem>>, vector<1x64xf32>
    %88 = arith.addf %87, %70 : vector<1x64xf32>
    %89 = math.tanh %88 : vector<1x64xf32>
    %cst_35 = arith.constant dense<0.000000e+00> : vector<1x192xf32>
    %90 = tpu.matmul %89, %34, %cst_35 {dimension_numbers = #tpu.dot_dimension_numbers<[1], [0], [0], [1], [0, 0, 1, 1], [], []>} : vector<1x64xf32>, vector<64x192xf32>, vector<1x192xf32> -> vector<1x192xf32>
    %91 = vector.extract_strided_slice %90 {offsets = [0, 0], sizes = [1, 128], strides = [1, 1]} : vector<1x192xf32> to vector<1x128xf32>
    %92 = arith.addf %91, %35 : vector<1x128xf32>
    %93 = vector.extract_strided_slice %90 {offsets = [0, 128], sizes = [1, 64], strides = [1, 1]} : vector<1x192xf32> to vector<1x64xf32>
    %cst_36 = arith.constant dense<0xFF800000> : vector<1xf32>
    %94 = vector.multi_reduction <maximumf>, %92, %cst_36 [1] : vector<1x128xf32> to vector<1xf32>
    %95 = vector.shape_cast %94 : vector<1xf32> to vector<1x1xf32>
    %96 = vector.broadcast %95 : vector<1x1xf32> to vector<1x128xf32>
    %97 = arith.cmpf oeq, %92, %96 : vector<1x128xf32>
    %cst_37 = arith.constant 1.280000e+02 : f32
    %98 = vector.broadcast %cst_37 : f32 to vector<1x128xf32>
    %99 = arith.select %97, %1, %98 : vector<1x128xi1>, vector<1x128xf32>
    %100 = vector.shape_cast %99 : vector<1x128xf32> to vector<1x1x128xf32>
    %cst_38 = arith.constant dense<0x7F800000> : vector<1xf32>
    %101 = vector.multi_reduction <minimumf>, %100, %cst_38 [1, 2] : vector<1x1x128xf32> to vector<1xf32>
    %102 = vector.shape_cast %101 : vector<1xf32> to vector<1x1x1xf32>
    %103 = vector.extract %102[0, 0, 0] : f32 from vector<1x1x1xf32>
    %104 = arith.fptosi %103 : f32 to i32
    %c3_39 = arith.constant 3 : index
    %105 = memref.load %arg0[%c3_39] : memref<6xi32, #tpu.memory_space<smem>>
    %c1_i32_40 = arith.constant 1 : i32
    %106 = arith.cmpi eq, %105, %c1_i32_40 : i32
    %c3_41 = arith.constant 3 : index
    %107 = memref.load %arg2[%c3_41] : memref<6xi32, #tpu.memory_space<smem>>
    %108 = arith.select %106, %107, %104 : i32
    %109 = arith.index_cast %108 : i32 to index
    %c0_42 = arith.constant 0 : index
    %110 = vector.load %arg5[%109, %c0_42] : memref<128x64xf32, #tpu.memory_space<vmem>>, vector<1x64xf32>
    %111 = arith.addf %110, %93 : vector<1x64xf32>
    %112 = math.tanh %111 : vector<1x64xf32>
    %cst_43 = arith.constant dense<0.000000e+00> : vector<1x192xf32>
    %113 = tpu.matmul %112, %34, %cst_43 {dimension_numbers = #tpu.dot_dimension_numbers<[1], [0], [0], [1], [0, 0, 1, 1], [], []>} : vector<1x64xf32>, vector<64x192xf32>, vector<1x192xf32> -> vector<1x192xf32>
    %114 = vector.extract_strided_slice %113 {offsets = [0, 0], sizes = [1, 128], strides = [1, 1]} : vector<1x192xf32> to vector<1x128xf32>
    %115 = arith.addf %114, %35 : vector<1x128xf32>
    %116 = vector.extract_strided_slice %113 {offsets = [0, 128], sizes = [1, 64], strides = [1, 1]} : vector<1x192xf32> to vector<1x64xf32>
    %cst_44 = arith.constant dense<0xFF800000> : vector<1xf32>
    %117 = vector.multi_reduction <maximumf>, %115, %cst_44 [1] : vector<1x128xf32> to vector<1xf32>
    %118 = vector.shape_cast %117 : vector<1xf32> to vector<1x1xf32>
    %119 = vector.broadcast %118 : vector<1x1xf32> to vector<1x128xf32>
    %120 = arith.cmpf oeq, %115, %119 : vector<1x128xf32>
    %cst_45 = arith.constant 1.280000e+02 : f32
    %121 = vector.broadcast %cst_45 : f32 to vector<1x128xf32>
    %122 = arith.select %120, %1, %121 : vector<1x128xi1>, vector<1x128xf32>
    %123 = vector.shape_cast %122 : vector<1x128xf32> to vector<1x1x128xf32>
    %cst_46 = arith.constant dense<0x7F800000> : vector<1xf32>
    %124 = vector.multi_reduction <minimumf>, %123, %cst_46 [1, 2] : vector<1x1x128xf32> to vector<1xf32>
    %125 = vector.shape_cast %124 : vector<1xf32> to vector<1x1x1xf32>
    %126 = vector.extract %125[0, 0, 0] : f32 from vector<1x1x1xf32>
    %127 = arith.fptosi %126 : f32 to i32
    %c4_47 = arith.constant 4 : index
    %128 = memref.load %arg0[%c4_47] : memref<6xi32, #tpu.memory_space<smem>>
    %c1_i32_48 = arith.constant 1 : i32
    %129 = arith.cmpi eq, %128, %c1_i32_48 : i32
    %c4_49 = arith.constant 4 : index
    %130 = memref.load %arg2[%c4_49] : memref<6xi32, #tpu.memory_space<smem>>
    %131 = arith.select %129, %130, %127 : i32
    %132 = arith.index_cast %131 : i32 to index
    %c0_50 = arith.constant 0 : index
    %133 = vector.load %arg5[%132, %c0_50] : memref<128x64xf32, #tpu.memory_space<vmem>>, vector<1x64xf32>
    %134 = arith.addf %133, %116 : vector<1x64xf32>
    %135 = math.tanh %134 : vector<1x64xf32>
    %cst_51 = arith.constant dense<0.000000e+00> : vector<1x192xf32>
    %136 = tpu.matmul %135, %34, %cst_51 {dimension_numbers = #tpu.dot_dimension_numbers<[1], [0], [0], [1], [0, 0, 1, 1], [], []>} : vector<1x64xf32>, vector<64x192xf32>, vector<1x192xf32> -> vector<1x192xf32>
    %137 = vector.extract_strided_slice %136 {offsets = [0, 0], sizes = [1, 128], strides = [1, 1]} : vector<1x192xf32> to vector<1x128xf32>
    %138 = arith.addf %137, %35 : vector<1x128xf32>
    %cst_52 = arith.constant 0.000000e+00 : f32
    %139 = vector.broadcast %cst_52 : f32 to vector<1x128xf32>
    %cst_53 = arith.constant 0.000000e+00 : f32
    %140 = vector.broadcast %cst_53 : f32 to vector<1x128xf32>
    %141 = tpu.concatenate %41, %46, %69, %92, %115, %138, %139, %140 in 0 : vector<1x128xf32>, vector<1x128xf32>, vector<1x128xf32>, vector<1x128xf32>, vector<1x128xf32>, vector<1x128xf32>, vector<1x128xf32>, vector<1x128xf32> -> vector<8x128xf32>
    %c0_54 = arith.constant 0 : index
    %c0_55 = arith.constant 0 : index
    %142 = vector.load %arg8[%c0_54, %c0_55] : memref<8x128xf32, #tpu.memory_space<vmem>>, vector<8x128xf32>
    tpu.vector_store %arg8[%c0_54, %c0_55], %141 {strides = array<i32>} : memref<8x128xf32, #tpu.memory_space<vmem>>, vector<8x128xf32>,
    return
  }
}

</mosaic_0001>

<bundles_post_ra>
// kernel: seq2seq_forward.1
= control target key start
LH: loop header
LB: loop body
LE: loop exit
PB: predicated region body
PF: predicated region fallthrough
CT: control target
= control target key end

     0   :  { %13 = vsyncpa [#allocation4], 0  ;;  %s1859_s0 = inlined_call_operand.vmem [shape: s32[6], index: 0, kind: input, shape index: {}]   ;;  %s1860_s1 = inlined_call_operand.vmem [shape: s32[5], index: 1, kind: input, shape index: {}]   ;;  %s1861_s2 = inlined_call_operand.vmem [shape: s32[6], index: 2, kind: input, shape index: {}]   ;;  %s1862_s3 = inlined_call_operand.vmem [shape: f32[24,64], index: 3, kind: input, shape index: {}]   ;;  %s1863_s4 = inlined_call_operand.vmem [shape: f32[64,64], index: 4, kind: input, shape index: {}]   ;;  %s1864_s5 = inlined_call_operand.vmem [shape: f32[128,64], index: 5, kind: input, shape index: {}]   ;;  %s1865_s6 = inlined_call_operand.vmem [shape: f32[64,192], index: 6, kind: input, shape index: {}]   ;;  %s1866_s7 = inlined_call_operand.vmem [shape: f32[1,128], index: 7, kind: input, shape index: {}]   ;;  %s1867_s8 = inlined_call_operand.hbm [shape: f32[8,128], index: 8, kind: output, shape index: {}]  }
   0x1   :  { %14 = vsyncpa [#allocation6], 0  ;;  %s32_s29 = sshll.u32 %s1860_s1, 4  ;;  %s33_s29 = int_to_ptr.vmem [resolvable:$true] %s32_s29 }
   0x2   :  { %15 = vsyncpa [#allocation3], 0  ;;  %s22_s10 = sshll.u32 %s1859_s0, 4  ;;  %s1462_s11 = scalar_lea.vmem %s33_s29, 16  ;;  %s23_s10 = int_to_ptr.vmem [resolvable:$true] %s22_s10 }
   0x3   :  { %p1463_p0 = scmp.ne.s32.totalorder %s33_s29, %s1462_s11  ;;  %p1467_p1 = scmp.lt.s32.totalorder %s33_s29, %s33_s29 }
   0x4   :  { %p1468_p2 = scmp.lt.s32.totalorder %s1462_s11, %s1462_s11 }
   0x6   :  { %p1469_p3 = por %p1468_p2, %p1467_p1 }
   0x8   :  { %p1470_p4 = pnand %p1469_p3, %p1463_p0 }
   0xa   :  { %1473 = shalt.err (!%p1470_p4)
}
   0xb   :  { %s1526_s12 = smov [#allocation5]   ;;  %s1474_s13 = scalar_lea.vmem %s23_s10, 16 }
   0xc   :  { %35 = dma.vmem_to_smem %s33_s29, 16, %s1526_s12, [#allocation6]  }
   0xd   :  { %p1475_p5 = scmp.ne.s32.totalorder %s23_s10, %s1474_s13  ;;  %p1479_p6 = scmp.lt.s32.totalorder %s23_s10, %s23_s10 }
   0xe   :  { %p1480_p7 = scmp.lt.s32.totalorder %s1474_s13, %s1474_s13 }
  0x10   :  { %p1481_p8 = por %p1480_p7, %p1479_p6 }
  0x12   :  { %p1482_p9 = pnand %p1481_p8, %p1475_p5 }
  0x14   :  { %1485 = shalt.err (!%p1482_p9)
}
  0x15   :  { %s1527_s1 = smov [#allocation2]   ;;  %s42_s15 = sshll.u32 %s1861_s2, 4  ;;  %s43_s15 = int_to_ptr.vmem [resolvable:$true] %s42_s15 }
  0x16   :  { %25 = dma.vmem_to_smem %s23_s10, 16, %s1527_s1, [#allocation4]  }
  0x17   :  { %s1486_s16 = scalar_lea.vmem %s43_s15, 16  ;;  %p1491_p11 = scmp.lt.s32.totalorder %s43_s15, %s43_s15 }
  0x18   :  { %p1487_p10 = scmp.ne.s32.totalorder %s43_s15, %s1486_s16  ;;  %p1492_p12 = scmp.lt.s32.totalorder %s1486_s16, %s1486_s16 }
  0x1a   :  { %p1493_p13 = por %p1492_p12, %p1491_p11 }
  0x1c   :  { %p1494_p0 = pnand %p1493_p13, %p1487_p10 }
  0x1e   :  { %1497 = shalt.err (!%p1494_p0)
}
  0x1f   :  { %s1528_s17 = smov [#allocation7]  }
  0x20   :  { %45 = dma.vmem_to_smem %s43_s15, 16, %s1528_s17, [#allocation6]  }
  0x21   :  { %1520 = dma.done.wait [#allocation4], 16  }
  0x22   :  { %1521 = vsyncadd [#allocation4], 4294967280 }
  0x23   :  { %1522 = dma.done.wait [#allocation6], 32  }
  0x24   :  { %1523 = vsyncadd [#allocation6], 4294967264 }
  0x25   :  { %65 = sfence }
  0x26   :  { %v69_v0 = vld [vmem:[%s1863_s4] sm:$0xff]  ;;  %v70_v1 = vld [vmem:[%s1863_s4 + $0x8] sm:$0xff]  ;;  %v71_v2 = vld [vmem:[%s1863_s4 + $0x10] sm:$0xff]  ;;  %v1529_v3 = vmov 0.0|0.0   ;;  %vm1530_vm0 = vmmov 0   ;;  %v1531_v6 = vmov 0.0  }
  0x27   :  { %1251 = vmatprep.subr.bf16.mxu0 %v1529_v3  ;;  %v1597_v4 = vpack.c.bf16 %v70_v1, %v69_v0  ;;  %v72_v5 = vld [vmem:[%s1863_s4 + $0x18] sm:$0xff]  ;;  %1172 = vmatprep.mubr.msk.f32.mxu0 %vm1530_vm0, %v1531_v6  ;;  %v73_v8 = vld [vmem:[%s1863_s4 + $0x20] sm:$0xff]  ;;  %v74_v9 = vld [vmem:[%s1863_s4 + $0x28] sm:$0xff]  ;;  %vm80_vm1 = vcmask 523264   ;;  %s1089_s1 = sld [smem:[#allocation5 + $0x1]]  ;;  %s1091_s16 = sld [smem:[#allocation5 + $0x2]] }
  0x28   :  { %1263 = vmatprep.subr.bf16.mxu1 %v1529_v3  ;;  %1191 = vmatprep.mubr.msk.f32.mxu1 %vm1530_vm0, %v1531_v6  ;;  %v1255_v7 = vpack.c.bf16 %v72_v5, %v71_v2  ;;  %v1258_v10 = vpack.c.bf16 %v74_v9, %v73_v8  ;;  %v75_v11 = vld [vmem:[%s1863_s4 + $0x30] sm:$0xff]  ;;  %v76_v12 = vld [vmem:[%s1863_s4 + $0x38] sm:$0xff]  ;;  %s77_s4 = sld [smem:[#allocation5]]  ;;  %v469_v29 = vld [vmem:[%s1865_s6 + $0x8] sm:$0xff]  ;;  %s1093_s27 = sld [smem:[#allocation5 + $0x3]]  ;;  %vm638_vm2 = vcmask 1040384  }
  0x29   :  { %1253 = vmatpush3.bf16.msra.mxu0 %v1597_v4  ;;  %1265 = vmatpush3.bf16.msra.mxu1 %v1597_v4  ;;  %v1261_v13 = vpack.c.bf16 %v76_v12, %v75_v11  ;;  %v471_v30 = vld [vmem:[%s1865_s6 + $0x18] sm:$0xff]  ;;  %v468_v31 = vld [vmem:[%s1865_s6] sm:$0xff]  ;;  %v470_v33 = vld [vmem:[%s1865_s6 + $0x10] sm:$0xff]  ;;  %s1102_s2 = sld [smem:[#allocation2 + $0x2]]  ;;  %s1105_s28 = sld [smem:[#allocation2 + $0x3]]  ;;  %vm1050_vm7 = vcmask 1041408  }
  0x2a   :  { %1254 = vmatprep.subr.bf16.mxu0 %v1529_v3  ;;  %1266 = vmatprep.subr.bf16.mxu1 %v1529_v3  ;;  %v1671_v32 = vpack.c.bf16 %v471_v30, %v469_v29  ;;  %v1676_v34 = vpack.c.bf16 %v470_v33, %v468_v31  ;;  %v473_v40 = vld [vmem:[%s1865_s6 + $0x28] sm:$0xff]  ;;  %v475_v41 = vld [vmem:[%s1865_s6 + $0x38] sm:$0xff]  ;;  %v472_v43 = vld [vmem:[%s1865_s6 + $0x20] sm:$0xff]  ;;  %s1103_s20 = sld [smem:[#allocation7 + $0x2]]  ;;  %s1108_s12 = sld [smem:[#allocation2 + $0x4]]  ;;  %vm1052_vm8 = vcmask 1042432  }
  0x2b   :  { %v1693_v42 = vpack.c.bf16 %v475_v41, %v473_v40  ;;  %v474_v44 = vld [vmem:[%s1865_s6 + $0x30] sm:$0xff]  ;;  %v477_v46 = vld [vmem:[%s1865_s6 + $0x48] sm:$0xff]  ;;  %v479_v47 = vld [vmem:[%s1865_s6 + $0x58] sm:$0xff]  ;;  %vm1054_vm9 = vcmask 1043456   ;;  %vm1056_vm10 = vcmask 1044480   ;;  %vm1058_vm11 = vcmask 1045504  }
  0x2c   :  { %v1701_v45 = vpack.c.bf16 %v474_v44, %v472_v43  ;;  %v476_v48 = vld [vmem:[%s1865_s6 + $0x40] sm:$0xff]  ;;  %v1716_v49 = vpack.c.bf16 %v479_v47, %v477_v46  ;;  %v478_v50 = vld [vmem:[%s1865_s6 + $0x50] sm:$0xff]  ;;  %v481_v51 = vld [vmem:[%s1865_s6 + $0x68] sm:$0xff]  ;;  %vm1060_vm12 = vcmask 1046528  }
  0x2d   :  { %1256 = vmatpush3.bf16.msra.mxu0 %v1255_v7  ;;  %1268 = vmatpush3.bf16.msra.mxu1 %v1255_v7  ;;  %s157_s15 = scalar_lea.vmem %s1862_s3, %s1089_s1  ;;  %s235_s19 = scalar_lea.vmem %s1862_s3, %s1091_s16  ;;  %v483_v52 = vld [vmem:[%s1865_s6 + $0x78] sm:$0xff]  ;;  %v1727_v53 = vpack.c.bf16 %v478_v50, %v476_v48  ;;  %v480_v55 = vld [vmem:[%s1865_s6 + $0x60] sm:$0xff]  ;;  %v482_v56 = vld [vmem:[%s1865_s6 + $0x70] sm:$0xff] }
  0x2e   :  { %1257 = vmatprep.subr.bf16.mxu0 %v1529_v3  ;;  %1269 = vmatprep.subr.bf16.mxu1 %v1529_v3  ;;  %s78_s13 = scalar_lea.vmem %s1862_s3, %s77_s4  ;;  %v158_v19 = vld [vmem:[%s157_s15] sm:$0x1]  ;;  %s313_s30 = scalar_lea.vmem %s1862_s3, %s1093_s27  ;;  %v1729_v54 = vpack.c.bf16 %v483_v52, %v481_v51  ;;  %v1740_v57 = vpack.c.bf16 %v482_v56, %v480_v55 }
  0x2f   :  { %v79_v14 = vld [vmem:[%s78_s13] sm:$0x1]  ;;  %s1095_s6 = sld [smem:[#allocation5 + $0x4]]  ;;  %s1100_s1 = sld [smem:[#allocation7 + $0x1]] }
  0x30   :  { %v236_v24 = vld [vmem:[%s235_s19] sm:$0x1]  ;;  %p755_p4 = scmp.eq.s32.totalorder %s1102_s2, 1  ;;  %p854_p6 = scmp.eq.s32.totalorder %s1105_s28, 1 }
  0x31   :  { %1259 = vmatpush3.bf16.msra.mxu0 %v1258_v10  ;;  %1271 = vmatpush3.bf16.msra.mxu1 %v1258_v10  ;;  %v314_v35 = vld [vmem:[%s313_s30] sm:$0x1]  ;;  %s1109_s13 = sld [smem:[#allocation7 + $0x4]]  ;;  %p953_p8 = scmp.eq.s32.totalorder %s1108_s12, 1 }
  0x32   :  { %1260 = vmatprep.subr.bf16.mxu0 %v1529_v3  ;;  %1272 = vmatprep.subr.bf16.mxu1 %v1529_v3 }
  0x35   :  { %1262 = vmatpush3.bf16.msra.mxu0 %v1261_v13  ;;  %1274 = vmatpush3.bf16.msra.mxu1 %v1261_v13  ;;  %s391_s9 = scalar_lea.vmem %s1862_s3, %s1095_s6  ;;  %s558_s3 = sld [smem:[#allocation7]] }
  0x36   :  { %1275 = vmatprep.subr.bf16.mxu0 %v1529_v3  ;;  %1287 = vmatprep.subr.bf16.mxu1 %v1529_v3  ;;  %v392_v58 = vld [vmem:[%s391_s9] sm:$0x1]  ;;  %s1106_s6 = sld [smem:[#allocation7 + $0x3]] }
  0x38   :  { %1173 = vmatmul.mubr.f32.vlgmr.msra.gmra.mrb[0].mxu0 %v1531_v6 }
  0x39   :  { %1277 = vmatpush3.bf16.msra.mxu0 %v1597_v4  ;;  %1210 = vmatprep.mubr.msk.f32.mxu0 %vm1530_vm0, %v1531_v6 }
  0x3a   :  { %1278 = vmatprep.subr.bf16.mxu0 %v1529_v3 }
  0x3b   :  { %s559_s11 = scalar_lea.vmem %s1864_s5, %s558_s3 }
  0x3c   :  { %v560_v63 = vld [vmem:[%s559_s11] sm:$0x1] }
  0x3d   :  { %1280 = vmatpush3.bf16.msra.mxu0 %v1255_v7 }
  0x3e   :  { %1281 = vmatprep.subr.bf16.mxu0 %v1529_v3 }
  0x41   :  { %1283 = vmatpush3.bf16.msra.mxu0 %v1258_v10 }
  0x42   :  { %1284 = vmatprep.subr.bf16.mxu0 %v1529_v3 }
  0x45   :  { %1286 = vmatpush3.bf16.msra.mxu0 %v1261_v13 }
  0x46   :  { %1299 = vmatprep.subr.bf16.mxu0 %v1529_v3 }
 0x10b   :  { %v150_v15 = vpop.f32.mrb[0].mxu0 }
 0x10c   :  { %v154_v16 = vadd.f32 %v150_v15, %v79_v14  ;;  %v1174_v17 = vpop.f32.mrb[1].mxu0 }
 0x10e   :  { %1442 = vtanh.f32 %v154_v16 }
 0x118   :  { %v1443_v18 = vpop.eup %1442 }
 0x119   :  { %1192 = vmatmul.mubr.msk.f32.vlgmr.msra.gmra.mrb[0].mxu1 %vm80_vm1, %v1443_v18 }
 0x11a   :  { %1289 = vmatpush3.bf16.msra.mxu1 %v1597_v4  ;;  %1229 = vmatprep.mubr.msk.f32.mxu1 %vm1530_vm0, %v1531_v6 }
 0x11b   :  { %1290 = vmatprep.subr.bf16.mxu1 %v1529_v3 }
 0x11e   :  { %1292 = vmatpush3.bf16.msra.mxu1 %v1255_v7 }
 0x11f   :  { %1293 = vmatprep.subr.bf16.mxu1 %v1529_v3 }
 0x122   :  { %1295 = vmatpush3.bf16.msra.mxu1 %v1258_v10 }
 0x123   :  { %1296 = vmatprep.subr.bf16.mxu1 %v1529_v3 }
 0x126   :  { %1298 = vmatpush3.bf16.msra.mxu1 %v1261_v13 }
 0x127   :  { %1312 = vmatprep.subr.bf16.mxu1 %v1671_v32 }
 0x1ec   :  { %v228_v20 = vpop.f32.mrb[0].mxu1 }
 0x1ed   :  { %v232_v21 = vadd.f32 %v228_v20, %v158_v19  ;;  %v1193_v22 = vpop.f32.mrb[1].mxu1 }
 0x1ef   :  { %1444 = vtanh.f32 %v232_v21 }
 0x1f9   :  { %v1445_v23 = vpop.eup %1444 }
 0x1fa   :  { %1211 = vmatmul.mubr.msk.f32.vlgmr.msra.gmra.mrb[2].mxu0 %vm80_vm1, %v1445_v23 }
 0x1fb   :  { %1301 = vmatpush3.bf16.msra.mxu0 %v1597_v4  ;;  %1248 = vmatprep.mubr.msk.f32.mxu0 %vm1530_vm0, %v1531_v6  ;;  %v1778_v4 = vld [vmem:[%s1866_s7] sm:$0x1]  ;;  %s1099_s7 = sld [smem:[#allocation2 + $0x1]] }
 0x1fc   :  { %1302 = vmatprep.subr.bf16.mxu0 %v1529_v3 }
 0x1ff   :  { %1304 = vmatpush3.bf16.msra.mxu0 %v1255_v7 }
 0x200   :  { %1305 = vmatprep.subr.bf16.mxu0 %v1529_v3 }
 0x201   :  { %p656_p2 = scmp.eq.s32.totalorder %s1099_s7, 1 }
 0x203   :  { %1307 = vmatpush3.bf16.msra.mxu0 %v1258_v10  ;;  %v66_v10 = vlaneseq }
 0x204   :  { %1308 = vmatprep.subr.bf16.mxu0 %v1529_v3 }
 0x205   :  { %v67_v11 = vand.u32 127, %v66_v10 }
 0x207   :  { %1310 = vmatpush3.bf16.msra.mxu0 %v1261_v13  ;;  %v1785_v12 = vcvt.s32.f32 %v67_v11 }
 0x208   :  { %1328 = vmatprep.subr.bf16.mxu0 %v1671_v32 }
 0x2cd   :  { %v306_v25 = vpop.f32.mrb[2].mxu0 }
 0x2ce   :  { %v310_v26 = vadd.f32 %v306_v25, %v236_v24  ;;  %v1212_v27 = vpop.f32.mrb[3].mxu0 }
 0x2d0   :  { %1446 = vtanh.f32 %v310_v26 }
 0x2da   :  { %v1447_v28 = vpop.eup %1446 }
 0x2db   :  { %1230 = vmatmul.mubr.msk.f32.vlgmr.msra.gmra.mrb[2].mxu1 %vm80_vm1, %v1447_v28 }
 0x2dc   :  { %552 = vmatprep.mubr.f32.mxu1 %v1531_v6  ;;  %1314 = vmatpush1.bf16.msra.mxu1 %v1676_v34 }
 0x2dd   :  { %1316 = vmatprep.subr.bf16.mxu1 %v1693_v42 }
 0x2e0   :  { %1318 = vmatpush1.bf16.msra.mxu1 %v1701_v45 }
 0x2e1   :  { %1320 = vmatprep.subr.bf16.mxu1 %v1716_v49 }
 0x2e4   :  { %1322 = vmatpush1.bf16.msra.mxu1 %v1727_v53 }
 0x2e5   :  { %1324 = vmatprep.subr.bf16.mxu1 %v1729_v54 }
 0x2e8   :  { %1326 = vmatpush1.bf16.msra.mxu1 %v1740_v57 }
 0x2e9   :  { %1344 = vmatprep.subr.bf16.mxu1 %v1671_v32 }
 0x3ae   :  { %v384_v36 = vpop.f32.mrb[2].mxu1 }
 0x3af   :  { %v388_v37 = vadd.f32 %v384_v36, %v314_v35  ;;  %v1231_v38 = vpop.f32.mrb[3].mxu1 }
 0x3b1   :  { %1448 = vtanh.f32 %v388_v37 }
 0x3bb   :  { %v1449_v39 = vpop.eup %1448 }
 0x3bc   :  { %1249 = vmatmul.mubr.msk.f32.vlgmr.msra.gmra.mrb[4].mxu0 %vm80_vm1, %v1449_v39 }
 0x3bd   :  { %1330 = vmatpush1.bf16.msra.mxu0 %v1676_v34  ;;  %630 = vmatprep.mubr.f32.mxu0 %v1531_v6 }
 0x3be   :  { %1332 = vmatprep.subr.bf16.mxu0 %v1693_v42 }
 0x3c1   :  { %1334 = vmatpush1.bf16.msra.mxu0 %v1701_v45 }
 0x3c2   :  { %1336 = vmatprep.subr.bf16.mxu0 %v1716_v49 }
 0x3c5   :  { %1338 = vmatpush1.bf16.msra.mxu0 %v1727_v53 }
 0x3c6   :  { %1340 = vmatprep.subr.bf16.mxu0 %v1729_v54 }
 0x3c9   :  { %1342 = vmatpush1.bf16.msra.mxu0 %v1740_v57 }
 0x3ca   :  { %1360 = vmatprep.subr.bf16.mxu0 %v1671_v32 }
 0x48f   :  { %v462_v59 = vpop.f32.mrb[4].mxu0 }
 0x490   :  { %v466_v60 = vadd.f32 %v462_v59, %v392_v58  ;;  %v1250_v61 = vpop.f32.mrb[5].mxu0 }
 0x492   :  { %1450 = vtanh.f32 %v466_v60 }
 0x49c   :  { %v1451_v62 = vpop.eup %1450 }
 0x49d   :  { %1097 = vmatmul.mubr.msk.f32.vlgmr.msra.gmra.mrb[4].mxu1 %vm80_vm1, %v1451_v62 }
 0x49e   :  { %1346 = vmatpush1.bf16.msra.mxu1 %v1676_v34  ;;  %730 = vmatprep.mubr.f32.mxu1 %v1531_v6 }
 0x49f   :  { %1348 = vmatprep.subr.bf16.mxu1 %v1693_v42 }
 0x4a2   :  { %1350 = vmatpush1.bf16.msra.mxu1 %v1701_v45 }
 0x4a3   :  { %1352 = vmatprep.subr.bf16.mxu1 %v1716_v49 }
 0x4a6   :  { %1354 = vmatpush1.bf16.msra.mxu1 %v1727_v53 }
 0x4a7   :  { %1356 = vmatprep.subr.bf16.mxu1 %v1729_v54 }
 0x4aa   :  { %1358 = vmatpush1.bf16.msra.mxu1 %v1740_v57 }
 0x4ab   :  { %1376 = vmatprep.subr.bf16.mxu1 %v1671_v32 }
 0x570   :  { %v554_v0 = vpop.f32.mrb[4].mxu1 }
 0x571   :  { %v555_v1 = vpop.f32.mrb[5].mxu1 }
 0x572   :  { %v561_v2 = vadd.f32 %v560_v63, %v555_v1 }
 0x574   :  { %1452 = vtanh.f32 %v561_v2 }
 0x57e   :  { %v1453_v3 = vpop.eup %1452 }
 0x57f   :  { %1098 = vmatmul.mubr.msk.f32.vlgmr.msra.gmra.mrb[6].mxu0 %vm80_vm1, %v1453_v3 }
 0x580   :  { %1362 = vmatpush1.bf16.msra.mxu0 %v1676_v34  ;;  %829 = vmatprep.mubr.f32.mxu0 %v1531_v6 }
 0x581   :  { %1364 = vmatprep.subr.bf16.mxu0 %v1693_v42 }
 0x584   :  { %1366 = vmatpush1.bf16.msra.mxu0 %v1701_v45 }
 0x585   :  { %1368 = vmatprep.subr.bf16.mxu0 %v1716_v49 }
 0x588   :  { %1370 = vmatpush1.bf16.msra.mxu0 %v1727_v53 }
 0x589   :  { %1372 = vmatprep.subr.bf16.mxu0 %v1729_v54 }
 0x58c   :  { %1374 = vmatpush1.bf16.msra.mxu0 %v1740_v57 }
 0x58d   :  { %1392 = vmatprep.subr.bf16.mxu0 %v1671_v32 }
 0x652   :  { %v632_v5 = vpop.f32.mrb[6].mxu0 }
 0x653   :  { %v1781_v7 = vadd.f32 %v632_v5, %v1778_v4  ;;  %v634_v8 = vpop.f32.mrb[7].mxu0 }
 0x655   :  { %v639_v9 = vsel %vm638_vm2, %v1781_v7, -inf }
 0x656   :  { %640 = vmax.xlane.f32.xlu0 %v639_v9 }
 0x6e3   :  { %v641_v13 = vpop.xlane.xlu0 %640 }
 0x6e4   :  { %vm642_vm3 = vcmp.eq.f32.partialorder %v1781_v7, %v641_v13 }
 0x6e5   :  { %v643_v14 = vsel %vm642_vm3, %v1785_v12, 128.0 }
 0x6e6   :  { %v644_v15 = vsel %vm638_vm2, %v643_v14, inf }
 0x6e7   :  { %645 = vmin.xlane.f32.xlu0 %v644_v15  ;;  %v1035_v15 = vrot.slane %v1781_v7, 7 }
 0x774   :  { %v646_v16 = vpop.xlane.xlu0 %645 }
 0x775   :  { %v647_v17 = vrot.slane %v646_v16, 4 }
 0x777   :  { %v648_v18 = vmin.f32 %v646_v16, %v647_v17 }
 0x779   :  { %v649_v19 = vrot.slane %v648_v18, 2 }
 0x77b   :  { %v650_v20 = vmin.f32 %v648_v18, %v649_v19 }
 0x77d   :  { %v651_v21 = vrot.slane %v650_v20, 1 }
 0x77f   :  { %v652_v22 = vmin.f32 %v650_v20, %v651_v21  ;;  %v1049_v20 = vsel %vm638_vm2, 0.0, %v1035_v15 }
 0x781   :  { %1407 = vpush %v652_v22 }
 0x7b2   :  { %s1408_s0 = spop %1407 }
 0x7b3   :  { %p1409_p1 = scmp.lt.s32.totalorder %s1408_s0, 0  ;;  %s1410_s14 = sceil.f32 %s1408_s0 }
 0x7b4   :  { %s1411_s15 = sfloor.f32 %s1408_s0 }
 0x7b5   :  { %s1869_s14 = smov (!%p1409_p1, %s1410_s14), %s1411_s15 }
 0x7b6   :  { %s1413_s16 = scvt.f32.s32 %s1869_s14 }
 0x7b8   :  { %s1871_s1 = smov (!%p656_p2, %s1100_s1), %s1413_s16 }
 0x7b9   :  { %s659_s19 = scalar_lea.vmem %s1864_s5, %s1871_s1 }
 0x7ba   :  { %v660_v23 = vld [vmem:[%s659_s19] sm:$0x1] }
 0x7bb   :  { %v661_v24 = vadd.f32 %v660_v23, %v634_v8 }
 0x7bd   :  { %1454 = vtanh.f32 %v661_v24 }
 0x7c7   :  { %v1455_v25 = vpop.eup %1454 }
 0x7c8   :  { %1101 = vmatmul.mubr.msk.f32.vlgmr.msra.gmra.mrb[6].mxu1 %vm80_vm1, %v1455_v25 }
 0x7c9   :  { %1378 = vmatpush1.bf16.msra.mxu1 %v1676_v34  ;;  %928 = vmatprep.mubr.f32.mxu1 %v1531_v6 }
 0x7ca   :  { %1380 = vmatprep.subr.bf16.mxu1 %v1693_v42 }
 0x7cd   :  { %1382 = vmatpush1.bf16.msra.mxu1 %v1701_v45 }
 0x7ce   :  { %1384 = vmatprep.subr.bf16.mxu1 %v1716_v49 }
 0x7d1   :  { %1386 = vmatpush1.bf16.msra.mxu1 %v1727_v53 }
 0x7d2   :  { %1388 = vmatprep.subr.bf16.mxu1 %v1729_v54 }
 0x7d5   :  { %1390 = vmatpush1.bf16.msra.mxu1 %v1740_v57 }
 0x89b   :  { %v732_v26 = vpop.f32.mrb[6].mxu1 }
 0x89c   :  { %v1803_v27 = vadd.f32 %v732_v26, %v1778_v4  ;;  %v734_v28 = vpop.f32.mrb[7].mxu1 }
 0x89e   :  { %v738_v29 = vsel %vm638_vm2, %v1803_v27, -inf  ;;  %v1038_v16 = vrot.slane %v1803_v27, 6 }
 0x89f   :  { %739 = vmax.xlane.f32.xlu1 %v738_v29 }
 0x8a0   :  { %v1051_v23 = vsel %vm1050_vm7, %v1049_v20, %v1038_v16 }
 0x92c   :  { %v740_v30 = vpop.xlane.xlu1 %739 }
 0x92d   :  { %vm741_vm4 = vcmp.eq.f32.partialorder %v1803_v27, %v740_v30 }
 0x92e   :  { %v742_v31 = vsel %vm741_vm4, %v1785_v12, 128.0 }
 0x92f   :  { %v743_v32 = vsel %vm638_vm2, %v742_v31, inf }
 0x930   :  { %744 = vmin.xlane.f32.xlu1 %v743_v32 }
 0x9bd   :  { %v745_v33 = vpop.xlane.xlu1 %744 }
 0x9be   :  { %v746_v35 = vrot.slane %v745_v33, 4 }
 0x9c0   :  { %v747_v36 = vmin.f32 %v745_v33, %v746_v35 }
 0x9c2   :  { %v748_v37 = vrot.slane %v747_v36, 2 }
 0x9c4   :  { %v749_v38 = vmin.f32 %v747_v36, %v748_v37 }
 0x9c6   :  { %v750_v39 = vrot.slane %v749_v38, 1 }
 0x9c8   :  { %v751_v40 = vmin.f32 %v749_v38, %v750_v39 }
 0x9ca   :  { %1414 = vpush %v751_v40 }
 0x9fb   :  { %s1415_s21 = spop %1414 }
 0x9fc   :  { %p1416_p3 = scmp.lt.s32.totalorder %s1415_s21, 0  ;;  %s1417_s22 = sceil.f32 %s1415_s21 }
 0x9fd   :  { %s1418_s23 = sfloor.f32 %s1415_s21 }
 0x9fe   :  { %s1873_s22 = smov (!%p1416_p3, %s1417_s22), %s1418_s23 }
 0x9ff   :  { %s1420_s24 = scvt.f32.s32 %s1873_s22 }
 0xa01   :  { %s1875_s20 = smov (!%p755_p4, %s1103_s20), %s1420_s24 }
 0xa02   :  { %s758_s27 = scalar_lea.vmem %s1864_s5, %s1875_s20 }
 0xa03   :  { %v759_v41 = vld [vmem:[%s758_s27] sm:$0x1] }
 0xa04   :  { %v760_v43 = vadd.f32 %v759_v41, %v734_v28 }
 0xa06   :  { %1456 = vtanh.f32 %v760_v43 }
 0xa10   :  { %v1457_v44 = vpop.eup %1456 }
 0xa11   :  { %1104 = vmatmul.mubr.msk.f32.vlgmr.msra.gmra.mrb[8].mxu0 %vm80_vm1, %v1457_v44 }
 0xa12   :  { %1394 = vmatpush1.bf16.msra.mxu0 %v1676_v34  ;;  %1027 = vmatprep.mubr.f32.mxu0 %v1531_v6 }
 0xa13   :  { %1396 = vmatprep.subr.bf16.mxu0 %v1693_v42 }
 0xa16   :  { %1398 = vmatpush1.bf16.msra.mxu0 %v1701_v45 }
 0xa17   :  { %1400 = vmatprep.subr.bf16.mxu0 %v1716_v49 }
 0xa1a   :  { %1402 = vmatpush1.bf16.msra.mxu0 %v1727_v53 }
 0xa1b   :  { %1404 = vmatprep.subr.bf16.mxu0 %v1729_v54 }
 0xa1e   :  { %1406 = vmatpush1.bf16.msra.mxu0 %v1740_v57 }
 0xae4   :  { %v831_v46 = vpop.f32.mrb[8].mxu0 }
 0xae5   :  { %v1823_v47 = vadd.f32 %v831_v46, %v1778_v4  ;;  %v833_v48 = vpop.f32.mrb[9].mxu0 }
 0xae7   :  { %v837_v6 = vsel %vm638_vm2, %v1823_v47, -inf  ;;  %v1041_v17 = vrot.slane %v1823_v47, 5 }
 0xae8   :  { %838 = vmax.xlane.f32.xlu0 %v837_v6 }
 0xae9   :  { %v1053_v25 = vsel %vm1052_vm8, %v1051_v23, %v1041_v17 }
 0xb75   :  { %v839_v34 = vpop.xlane.xlu0 %838 }
 0xb76   :  { %vm840_vm5 = vcmp.eq.f32.partialorder %v1823_v47, %v839_v34 }
 0xb77   :  { %v841_v42 = vsel %vm840_vm5, %v1785_v12, 128.0 }
 0xb78   :  { %v842_v45 = vsel %vm638_vm2, %v841_v42, inf }
 0xb79   :  { %843 = vmin.xlane.f32.xlu1 %v842_v45 }
 0xc06   :  { %v844_v49 = vpop.xlane.xlu1 %843 }
 0xc07   :  { %v845_v50 = vrot.slane %v844_v49, 4 }
 0xc09   :  { %v846_v51 = vmin.f32 %v844_v49, %v845_v50 }
 0xc0b   :  { %v847_v52 = vrot.slane %v846_v51, 2 }
 0xc0d   :  { %v848_v53 = vmin.f32 %v846_v51, %v847_v52 }
 0xc0f   :  { %v849_v54 = vrot.slane %v848_v53, 1 }
 0xc11   :  { %v850_v55 = vmin.f32 %v848_v53, %v849_v54 }
 0xc13   :  { %1421 = vpush %v850_v55 }
 0xc44   :  { %s1422_s29 = spop %1421 }
 0xc45   :  { %p1423_p5 = scmp.lt.s32.totalorder %s1422_s29, 0  ;;  %s1424_s30 = sceil.f32 %s1422_s29 }
 0xc46   :  { %s1425_s9 = sfloor.f32 %s1422_s29 }
 0xc47   :  { %s1877_s30 = smov (!%p1423_p5, %s1424_s30), %s1425_s9 }
 0xc48   :  { %s1427_s3 = scvt.f32.s32 %s1877_s30 }
 0xc4a   :  { %s1879_s6 = smov (!%p854_p6, %s1106_s6), %s1427_s3 }
 0xc4b   :  { %s857_s11 = scalar_lea.vmem %s1864_s5, %s1879_s6 }
 0xc4c   :  { %v858_v56 = vld [vmem:[%s857_s11] sm:$0x1] }
 0xc4d   :  { %v859_v57 = vadd.f32 %v858_v56, %v833_v48 }
 0xc4f   :  { %1458 = vtanh.f32 %v859_v57 }
 0xc59   :  { %v1459_v58 = vpop.eup %1458 }
 0xc5a   :  { %1107 = vmatmul.mubr.msk.f32.vlgmr.msra.gmra.mrb[8].mxu1 %vm80_vm1, %v1459_v58 }
 0xd2d   :  { %v930_v59 = vpop.f32.mrb[8].mxu1 }
 0xd2e   :  { %v935_v60 = vadd.f32 %v930_v59, %v1778_v4  ;;  %v932_v61 = vpop.f32.mrb[9].mxu1 }
 0xd30   :  { %v936_v62 = vsel %vm638_vm2, %v935_v60, -inf  ;;  %v1044_v18 = vrot.slane %v935_v60, 4 }
 0xd31   :  { %937 = vmax.xlane.f32.xlu0 %v936_v62 }
 0xd32   :  { %v1055_v7 = vsel %vm1054_vm9, %v1053_v25, %v1044_v18 }
 0xdbe   :  { %v938_v63 = vpop.xlane.xlu0 %937 }
 0xdbf   :  { %vm939_vm6 = vcmp.eq.f32.partialorder %v935_v60, %v938_v63 }
 0xdc0   :  { %v940_v0 = vsel %vm939_vm6, %v1785_v12, 128.0 }
 0xdc1   :  { %v941_v1 = vsel %vm638_vm2, %v940_v0, inf }
 0xdc2   :  { %942 = vmin.xlane.f32.xlu1 %v941_v1 }
 0xe4f   :  { %v943_v2 = vpop.xlane.xlu1 %942 }
 0xe50   :  { %v944_v3 = vrot.slane %v943_v2, 4 }
 0xe52   :  { %v945_v5 = vmin.f32 %v943_v2, %v944_v3 }
 0xe54   :  { %v946_v8 = vrot.slane %v945_v5, 2 }
 0xe56   :  { %v947_v9 = vmin.f32 %v945_v5, %v946_v8 }
 0xe58   :  { %v948_v10 = vrot.slane %v947_v9, 1 }
 0xe5a   :  { %v949_v11 = vmin.f32 %v947_v9, %v948_v10 }
 0xe5c   :  { %1428 = vpush %v949_v11 }
 0xe8d   :  { %s1429_s7 = spop %1428 }
 0xe8e   :  { %p1430_p7 = scmp.lt.s32.totalorder %s1429_s7, 0  ;;  %s1431_s1 = sceil.f32 %s1429_s7 }
 0xe8f   :  { %s1432_s0 = sfloor.f32 %s1429_s7 }
 0xe90   :  { %s1881_s1 = smov (!%p1430_p7, %s1431_s1), %s1432_s0 }
 0xe91   :  { %s1434_s14 = scvt.f32.s32 %s1881_s1 }
 0xe93   :  { %s1883_s13 = smov (!%p953_p8, %s1109_s13), %s1434_s14 }
 0xe94   :  { %s956_s17 = scalar_lea.vmem %s1864_s5, %s1883_s13  ;;  %s1532_s5 = smov [#allocation8]  }
 0xe95   :  { %v957_v12 = vld [vmem:[%s956_s17] sm:$0x1]  ;;  %s1069_s18 = sshll.u32 %s1532_s5, 4  ;;  %s1070_s18 = int_to_ptr.vmem [resolvable:$true] %s1069_s18 }
 0xe96   :  { %v958_v13 = vadd.f32 %v957_v12, %v932_v61  ;;  %s1498_s19 = scalar_lea.vmem %s1070_s18, 128  ;;  %p1503_p10 = scmp.lt.s32.totalorder %s1070_s18, %s1070_s18 }
 0xe97   :  { %p1499_p9 = scmp.ne.s32.totalorder %s1070_s18, %s1498_s19  ;;  %p1504_p11 = scmp.lt.s32.totalorder %s1498_s19, %s1498_s19 }
 0xe98   :  { %1460 = vtanh.f32 %v958_v13 }
 0xe99   :  { %p1505_p12 = por %p1504_p11, %p1503_p10 }
 0xe9b   :  { %p1506_p13 = pnand %p1505_p12, %p1499_p9 }
 0xea2   :  { %v1461_v14 = vpop.eup %1460 }
 0xea3   :  { %1110 = vmatmul.mubr.msk.f32.vlgmr.msra.gmra.mrb[10].mxu0 %vm80_vm1, %v1461_v14 }
 0xf76   :  { %v1029_v19 = vpop.f32.mrb[10].mxu0 }
 0xf77   :  { %v1033_v21 = vadd.f32 %v1029_v19, %v1778_v4  ;;  %v1031_v22 = vpop.f32.mrb[11].mxu0 }
 0xf79   :  { %v1047_v24 = vrot.slane %v1033_v21, 3 }
 0xf7b   :  { %v1057_v26 = vsel %vm1056_vm10, %v1055_v7, %v1047_v24 }
 0xf7c   :  { %v1059_v27 = vsel %vm1058_vm11, %v1057_v26, 0.0 }
 0xf7d   :  { %v1061_v28 = vsel %vm1060_vm12, %v1059_v27, 0.0 }
 0xf7e   :  { %1062 = vst [vmem:[#allocation8] sm:$0xff] %v1061_v28 }
 0xf7f   :  { %1509 = shalt.err (!%p1506_p13)
}
 0xf80   :  { %s1510_s21 = scalar_lea.hbm %s1867_s8, 128 }
 0xf81   :  { %p1511_p0 = scmp.ne.s32.totalorder %s1867_s8, %s1510_s21  ;;  %p1514_p1 = scmp.lt.u32.totalorder %s1510_s21, %s1867_s8 }
 0xf83   :  { %p1516_p2 = pnand %p1514_p1, %p1511_p0 }
 0xf85   :  { %1519 = shalt.err (!%p1516_p2)
}
 0xf86   :  { %1072 = dma.vmem_to_hbm [thread:$0]  %s1070_s18, 128, %s1867_s8, [#allocation3]  }
 0xf87   :  { %1524 = dma.done.wait [#allocation3], 128  }
 0xf88   :  { %1525 = vsyncadd [#allocation3], 4294967168 }
 0xf89   :  { %1076 = vsyncpa [#allocation3], 1 }
 0xf8a   :  { %1077 = vsyncpa [#allocation4], 1 }
 0xf8b   :  { %1078 = vsyncpa [#allocation6], 1 }

</bundles_post_ra>
